<compile_context>
chip_gen: v7x
topology: tpu7x:2x2x1
jax: 0.10.0
libtpu: 0.0.40
codegen_flags: <defaults>
</compile_context>

<pallas_src>
import functools
import math

import jax
import jax.numpy as jnp
from jax.experimental import pallas as pl
from jax.experimental.pallas import tpu as pltpu

_MIB = 1024 * 1024


def _round_up(x: int, m: int) -> int:
    return ((x + m - 1) // m) * m


def _vmem_capacity_bytes() -> int:
    """Physical VMEM per core; conservative 64 MiB fallback (smallest current gen)."""
    try:
        info = pltpu.get_tpu_info()
        cap = int(getattr(info, "vmem_capacity_bytes", 0) or 0)
        if cap > 0:
            return cap
    except Exception:
        pass
    return 64 * _MIB


def _vmem_footprint_bytes(tm: int, D: int, V_pad: int, tv: int, cd: int, od: int) -> int:
    return (2 * tm * D * cd          # token tile, double-buffered over i
            + 2 * D * tv * cd        # streamed weight tile, double-buffered over j
            + 2 * tv * 4             # streamed bias tile (f32)
            + 2 * tm * V_pad * od    # resident output block, double-buffered over i
            + 2 * tm * 128 * 4       # (tm,1) f32 LSE accumulators (lane-padded)
            + 2 * _MIB)              # misc / compiler scratch slack


def _select_tm(tm_max: int, M: int, D: int, V_pad: int, tv: int,
               cd: int, od: int, budget: int) -> int:
    """Largest row tile (multiple of 8, <= tm_max, <= padded M) whose footprint fits."""
    tm_cap = max(8, (min(int(tm_max), _round_up(M, 8)) // 8) * 8)
    cands = [c for c in (1024, 512, 384, 256, 128, 64, 32, 16, 8) if c <= tm_cap]
    if not cands or cands[0] != tm_cap:
        cands = [tm_cap] + cands
    for c in cands:
        if _vmem_footprint_bytes(c, D, V_pad, tv, cd, od) <= budget:
            return c
    return cands[-1]


def prepare_output_projection_params(weight, bias, *, tv: int = 512,
                                     compute_dtype=jnp.bfloat16):
    """One-time parameter relayout for the kernel (run once and cache the result).

    weight: [vocab, d_model] (PyTorch nn.Linear layout), bias: [vocab].
    Returns the weight as [d_model, vocab_pad] in `compute_dtype` (so the in-kernel MXU
    contraction needs no per-tile transpose), the bias as f32 [1, vocab_pad] with -1e30
    in padded columns, plus the vocab tile width actually used.
    """
    V, D = weight.shape
    assert bias.shape == (V,), "bias/vocab mismatch"
    # Vocab tile: a multiple of 128, no wider than the 128-padded vocab.
    tv = max(128, (min(int(tv), _round_up(V, 128)) // 128) * 128)
    V_pad = _round_up(V, tv)

    w_dv = jnp.asarray(weight).T.astype(compute_dtype)           # [D, V] one-time relayout
    b = jnp.asarray(bias).astype(jnp.float32)
    if V_pad != V:
        w_dv = jnp.pad(w_dv, ((0, 0), (0, V_pad - V)))
        # Large finite negative (NOT -inf) so padded columns contribute exp(...) == 0
        # without ever producing an all--inf row (which would NaN the online LSE).
        b = jnp.pad(b, (0, V_pad - V), constant_values=-1e30)
    return {"weight_dv": w_dv, "bias_row": b.reshape(1, V_pad),
            "tv": tv, "vocab_len": V}


def _output_projection_kernel(x_ref, w_ref, b_ref, o_ref, m_ref, l_ref, *, tv: int):
    # x_ref: (tm, D)         token tile (compute dtype), resident across the vocab axis
    # w_ref: (D, tv)         streamed weight tile ([D, V_pad] layout -> no XLU transpose)
    # b_ref: (1, tv)         streamed bias tile (f32; -1e30 in padded vocab columns)
    # o_ref: (tm, V_pad)     output block, resident across the vocab grid axis; holds raw
    #                        logits until the last vocab step normalizes it in place
    # m_ref, l_ref: (tm, 1)  online log-sum-exp accumulators (f32)
    j = pl.program_id(1)
    nj = pl.num_programs(1)

    @pl.when(j == 0)
    def _init():
        m_ref[...] = jnp.full(m_ref.shape, -jnp.inf, dtype=m_ref.dtype)
        l_ref[...] = jnp.zeros(l_ref.shape, dtype=l_ref.dtype)

    # (tm, tv) logits: plain MXU contraction on D with f32 accumulation.
    logits = jnp.dot(x_ref[...], w_ref[...], preferred_element_type=jnp.float32)
    logits = logits + b_ref[...]

    # Stash raw logits directly in the resident output block (128-aligned lane slice),
    # reusing it as the scratch so no separate (nj, tm, tv) buffer is needed.
    col = pl.multiple_of(j * tv, 128)
    o_ref[:, pl.ds(col, tv)] = logits.astype(o_ref.dtype)

    # Online log-sum-exp over vocab tiles (all math stays f32).
    m_prev = m_ref[...]
    m_new = jnp.maximum(m_prev, jnp.max(logits, axis=-1, keepdims=True))
    l_ref[...] = (l_ref[...] * jnp.exp(m_prev - m_new)
                  + jnp.sum(jnp.exp(logits - m_new), axis=-1, keepdims=True))
    m_ref[...] = m_new

    @pl.when(j == nj - 1)
    def _finalize():
        lse = m_ref[...] + jnp.log(l_ref[...])                   # (tm, 1)

        def body(jj, carry):
            c = pl.multiple_of(jj * tv, 128)
            tile = o_ref[:, pl.ds(c, tv)].astype(jnp.float32)
            o_ref[:, pl.ds(c, tv)] = (tile - lse).astype(o_ref.dtype)
            return carry

        jax.lax.fori_loop(0, nj, body, 0)


def output_projection(x, params, *, tm: int = 512, out_dtype=jnp.float32,
                      vmem_headroom_bytes: int = 8 * _MIB):
    """log_softmax(x @ W.T + b, axis=-1), with (W, b) prepacked by
    prepare_output_projection_params.

    x: [B, S, d_model]  ->  [B, S, vocab] in `out_dtype`.
    """
    w_dv, b_row = params["weight_dv"], params["bias_row"]
    tv, V = params["tv"], params["vocab_len"]
    D, V_pad = w_dv.shape
    B, S, D2 = x.shape
    assert D == D2, "weight/input feature mismatch"
    assert V_pad % tv == 0

    M = B * S
    cd = w_dv.dtype.itemsize
    od = jnp.dtype(out_dtype).itemsize

    # Size tiles from the real VMEM capacity of this generation (64 MiB v7x,
    # 128 MiB v5e/v6e), leaving headroom, instead of a hard-coded 64 MiB cap.
    budget = max(_vmem_capacity_bytes() - vmem_headroom_bytes, 16 * _MIB)
    tm = _select_tm(tm, M, D, V_pad, tv, cd, od, budget)
    M_pad = _round_up(M, tm)
    nj = V_pad // tv

    x2 = x.reshape(M, D).astype(w_dv.dtype)
    if M_pad != M:
        x2 = jnp.pad(x2, ((0, M_pad - M), (0, 0)))

    footprint = _vmem_footprint_bytes(tm, D, V_pad, tv, cd, od)
    vmem_limit = int(min(budget, max(32 * _MIB, footprint * 5 // 4)))

    kernel = functools.partial(_output_projection_kernel, tv=tv)

    out = pl.pallas_call(
        kernel,
        out_shape=jax.ShapeDtypeStruct((M_pad, V_pad), out_dtype),
        grid_spec=pltpu.PrefetchScalarGridSpec(
            num_scalar_prefetch=0,
            grid=(M_pad // tm, nj),
            in_specs=[
                pl.BlockSpec((tm, D), lambda i, j: (i, 0)),    # token tile (resident over j)
                pl.BlockSpec((D, tv), lambda i, j: (0, j)),    # streamed weight tile
                pl.BlockSpec((1, tv), lambda i, j: (0, j)),    # streamed bias tile
            ],
            out_specs=pl.BlockSpec((tm, V_pad), lambda i, j: (i, 0)),
            scratch_shapes=[
                pltpu.VMEM((tm, 1), jnp.float32),              # running max
                pltpu.VMEM((tm, 1), jnp.float32),              # running sum
            ],
        ),
        compiler_params=pltpu.CompilerParams(
            dimension_semantics=("parallel", "arbitrary"),
            vmem_limit_bytes=vmem_limit,
        ),
    )(x2, w_dv, b_row)

    return out[:M, :V].reshape(B, S, V)


def output_projection_from_linear(x, weight, bias, *, tv: int = 512,
                                  compute_dtype=jnp.bfloat16, **kw):
    """Convenience wrapper taking PyTorch-layout params.  NOTE: re-runs the one-time
    weight relayout/cast every call; when calling repeatedly, cache the result of
    prepare_output_projection_params() and call output_projection() directly."""
    params = prepare_output_projection_params(weight, bias, tv=tv,
                                              compute_dtype=compute_dtype)
    return output_projection(x, params, **kw)


if __name__ == "__main__":
    # Small module-consistent shapes: batch=2, seq=8, d_model=32.
    # vocab=250 is deliberately NOT a multiple of 128 so the vocab-padding path and the
    # multi-tile online log-sum-exp (tv=128 -> 2 vocab tiles) are both exercised.
    B, S, D, V = 2, 8, 32, 250

    key = jax.random.PRNGKey(0)
    kx, kw, kb = jax.random.split(key, 3)
    x = jax.random.normal(kx, (B, S, D), dtype=jnp.float32)
    bound = 1.0 / math.sqrt(D)   # nn.Linear default init range
    weight = jax.random.uniform(kw, (V, D), jnp.float32, -bound, bound)
    bias = jax.random.uniform(kb, (V,), jnp.float32, -bound, bound)

    ref = jax.nn.log_softmax(x @ weight.T + bias, axis=-1)

    # f32 compute path: tight check of the streamed online log-softmax + vocab padding.
    p_f32 = prepare_output_projection_params(weight, bias, tv=128,
                                             compute_dtype=jnp.float32)
    out_f32 = jax.block_until_ready(output_projection(x, p_f32))
    assert out_f32.shape == (B, S, V)
    assert jnp.allclose(out_f32, ref, atol=1e-4, rtol=1e-4), "f32 path mismatch"

    # Default bf16-MXU-operand path (f32 accumulation / f32 softmax math).
    p_bf16 = prepare_output_projection_params(weight, bias, tv=128)
    out_bf16 = jax.block_until_ready(output_projection(x, p_bf16))
    assert out_bf16.shape == (B, S, V)
    assert jnp.allclose(out_bf16, ref, atol=5e-2), "bf16 path mismatch"

    print("KERNEL_OK")
</pallas_src>

<mosaic_0001>
module attributes {stable_mosaic.version = 11 : i64} {
  func.func @_output_projection_kernel(%arg0: i32, %arg1: i32, %arg2: memref<16x32xf32, #tpu.memory_space<vmem>>, %arg3: memref<32x128xf32, #tpu.memory_space<vmem>>, %arg4: memref<1x128xf32, #tpu.memory_space<vmem>>, %arg5: memref<16x256xf32, #tpu.memory_space<vmem>>, %arg6: memref<16x1xf32, #tpu.memory_space<vmem>>, %arg7: memref<16x1xf32, #tpu.memory_space<vmem>>) attributes {dimension_semantics = [#tpu.dimension_semantics<parallel>, #tpu.dimension_semantics<arbitrary>], iteration_bounds = array<i64: 1, 2>, scalar_prefetch = 0 : i64, scratch_operands = 2 : i64, tpu.core_type = #tpu.core_type<tc>, window_params = [{transform_indices = @transform_0, window_bounds = array<i64: 16, 32>}, {transform_indices = @transform_1, window_bounds = array<i64: 32, 128>}, {transform_indices = @transform_2, window_bounds = array<i64: 1, 128>}, {transform_indices = @transform_3, window_bounds = array<i64: 16, 256>}]} {
    %c0_i32 = arith.constant 0 : i32
    %0 = arith.cmpi eq, %arg1, %c0_i32 : i32
    %1 = arith.extui %0 : i1 to i32
    %c0_i32_0 = arith.constant 0 : i32
    %2 = arith.cmpi ne, %1, %c0_i32_0 : i32
    scf.if %2 {
      %cst_18 = arith.constant 0xFF800000 : f32
      %32 = vector.broadcast %cst_18 : f32 to vector<16x1xf32>
      %c0_19 = arith.constant 0 : index
      %c0_20 = arith.constant 0 : index
      %33 = vector.load %arg6[%c0_19, %c0_20] : memref<16x1xf32, #tpu.memory_space<vmem>>, vector<16x1xf32>
      tpu.vector_store %arg6[%c0_19, %c0_20], %32 {strides = array<i32>} : memref<16x1xf32, #tpu.memory_space<vmem>>, vector<16x1xf32>,
      %cst_21 = arith.constant 0.000000e+00 : f32
      %34 = vector.broadcast %cst_21 : f32 to vector<16x1xf32>
      %c0_22 = arith.constant 0 : index
      %c0_23 = arith.constant 0 : index
      %35 = vector.load %arg7[%c0_22, %c0_23] : memref<16x1xf32, #tpu.memory_space<vmem>>, vector<16x1xf32>
      tpu.vector_store %arg7[%c0_22, %c0_23], %34 {strides = array<i32>} : memref<16x1xf32, #tpu.memory_space<vmem>>, vector<16x1xf32>,
    } else {
    }
    %c0 = arith.constant 0 : index
    %c0_1 = arith.constant 0 : index
    %3 = vector.load %arg2[%c0, %c0_1] : memref<16x32xf32, #tpu.memory_space<vmem>>, vector<16x32xf32>
    %c0_2 = arith.constant 0 : index
    %c0_3 = arith.constant 0 : index
    %4 = vector.load %arg3[%c0_2, %c0_3] : memref<32x128xf32, #tpu.memory_space<vmem>>, vector<32x128xf32>
    %cst = arith.constant dense<0.000000e+00> : vector<16x128xf32>
    %5 = tpu.matmul %3, %4, %cst {dimension_numbers = #tpu.dot_dimension_numbers<[1], [0], [0], [1], [0, 0, 1, 1], [], []>} : vector<16x32xf32>, vector<32x128xf32>, vector<16x128xf32> -> vector<16x128xf32>
    %c0_4 = arith.constant 0 : index
    %c0_5 = arith.constant 0 : index
    %6 = vector.load %arg4[%c0_4, %c0_5] : memref<1x128xf32, #tpu.memory_space<vmem>>, vector<1x128xf32>
    %7 = vector.broadcast %6 : vector<1x128xf32> to vector<16x128xf32>
    %8 = arith.addf %5, %7 : vector<16x128xf32>
    %c128_i32 = arith.constant 128 : i32
    %9 = arith.muli %arg1, %c128_i32 : i32
    %10 = tpu.assume_multiple %9, 128 : i32
    %c0_6 = arith.constant 0 : index
    %11 = arith.index_cast %10 : i32 to index
    %12 = vector.load %arg5[%c0_6, %11] : memref<16x256xf32, #tpu.memory_space<vmem>>, vector<16x128xf32>
    tpu.vector_store %arg5[%c0_6, %11], %8 {strides = array<i32>} : memref<16x256xf32, #tpu.memory_space<vmem>>, vector<16x128xf32>,
    %c0_7 = arith.constant 0 : index
    %c0_8 = arith.constant 0 : index
    %13 = vector.load %arg6[%c0_7, %c0_8] : memref<16x1xf32, #tpu.memory_space<vmem>>, vector<16x1xf32>
    %cst_9 = arith.constant dense<0xFF800000> : vector<16xf32>
    %14 = vector.multi_reduction <maximumf>, %8, %cst_9 [1] : vector<16x128xf32> to vector<16xf32>
    %15 = vector.shape_cast %14 : vector<16xf32> to vector<16x1xf32>
    %16 = arith.maximumf %13, %15 : vector<16x1xf32>
    %c0_10 = arith.constant 0 : index
    %c0_11 = arith.constant 0 : index
    %17 = vector.load %arg7[%c0_10, %c0_11] : memref<16x1xf32, #tpu.memory_space<vmem>>, vector<16x1xf32>
    %18 = arith.subf %13, %16 : vector<16x1xf32>
    %19 = math.exp %18 : vector<16x1xf32>
    %20 = arith.mulf %17, %19 : vector<16x1xf32>
    %21 = vector.broadcast %16 : vector<16x1xf32> to vector<16x128xf32>
    %22 = arith.subf %8, %21 : vector<16x128xf32>
    %23 = math.exp %22 : vector<16x128xf32>
    %cst_12 = arith.constant dense<0.000000e+00> : vector<16xf32>
    %24 = vector.multi_reduction <add>, %23, %cst_12 [1] : vector<16x128xf32> to vector<16xf32>
    %25 = vector.shape_cast %24 : vector<16xf32> to vector<16x1xf32>
    %26 = arith.addf %20, %25 : vector<16x1xf32>
    %c0_13 = arith.constant 0 : index
    %c0_14 = arith.constant 0 : index
    %27 = vector.load %arg7[%c0_13, %c0_14] : memref<16x1xf32, #tpu.memory_space<vmem>>, vector<16x1xf32>
    tpu.vector_store %arg7[%c0_13, %c0_14], %26 {strides = array<i32>} : memref<16x1xf32, #tpu.memory_space<vmem>>, vector<16x1xf32>,
    %c0_15 = arith.constant 0 : index
    %c0_16 = arith.constant 0 : index
    %28 = vector.load %arg6[%c0_15, %c0_16] : memref<16x1xf32, #tpu.memory_space<vmem>>, vector<16x1xf32>
    tpu.vector_store %arg6[%c0_15, %c0_16], %16 {strides = array<i32>} : memref<16x1xf32, #tpu.memory_space<vmem>>, vector<16x1xf32>,
    %c1_i32 = arith.constant 1 : i32
    %29 = arith.cmpi eq, %arg1, %c1_i32 : i32
    %30 = arith.extui %29 : i1 to i32
    %c0_i32_17 = arith.constant 0 : i32
    %31 = arith.cmpi ne, %30, %c0_i32_17 : i32
    scf.if %31 {
      %c0_18 = arith.constant 0 : index
      %c0_19 = arith.constant 0 : index
      %32 = vector.load %arg6[%c0_18, %c0_19] : memref<16x1xf32, #tpu.memory_space<vmem>>, vector<16x1xf32>
      %c0_20 = arith.constant 0 : index
      %c0_21 = arith.constant 0 : index
      %33 = vector.load %arg7[%c0_20, %c0_21] : memref<16x1xf32, #tpu.memory_space<vmem>>, vector<16x1xf32>
      %34 = math.log %33 : vector<16x1xf32>
      %35 = arith.addf %32, %34 : vector<16x1xf32>
      %c0_i32_22 = arith.constant 0 : i32
      %c2_i32 = arith.constant 2 : i32
      %36 = arith.addi %c0_i32_22, %c2_i32 : i32
      %c1_i32_23 = arith.constant 1 : i32
      scf.for %arg8 = %c0_i32_22 to %36 step %c1_i32_23  : i32 {
        %c128_i32_25 = arith.constant 128 : i32
        %37 = arith.muli %arg8, %c128_i32_25 : i32
        %38 = tpu.assume_multiple %37, 128 : i32
        %c0_26 = arith.constant 0 : index
        %39 = arith.index_cast %38 : i32 to index
        %40 = vector.load %arg5[%c0_26, %39] : memref<16x256xf32, #tpu.memory_space<vmem>>, vector<16x128xf32>
        %41 = vector.broadcast %35 : vector<16x1xf32> to vector<16x128xf32>
        %42 = arith.subf %40, %41 : vector<16x128xf32>
        %c0_27 = arith.constant 0 : index
        %43 = arith.index_cast %38 : i32 to index
        %44 = vector.load %arg5[%c0_27, %43] : memref<16x256xf32, #tpu.memory_space<vmem>>, vector<16x128xf32>
        tpu.vector_store %arg5[%c0_27, %43], %42 {strides = array<i32>} : memref<16x256xf32, #tpu.memory_space<vmem>>, vector<16x128xf32>,
      }
      %c2_i32_24 = arith.constant 2 : i32
    } else {
    }
    return
  }
  func.func @transform_0(%arg0: i32, %arg1: i32) -> (i32, i32) {
    %c0_i32 = arith.constant 0 : i32
    %c0_i32_0 = arith.constant 0 : i32
    return %arg0, %c0_i32 : i32, i32
  }
  func.func @transform_1(%arg0: i32, %arg1: i32) -> (i32, i32) {
    %c0_i32 = arith.constant 0 : i32
    %c0_i32_0 = arith.constant 0 : i32
    return %c0_i32, %arg1 : i32, i32
  }
  func.func @transform_2(%arg0: i32, %arg1: i32) -> (i32, i32) {
    %c0_i32 = arith.constant 0 : i32
    %c0_i32_0 = arith.constant 0 : i32
    return %c0_i32, %arg1 : i32, i32
  }
  func.func @transform_3(%arg0: i32, %arg1: i32) -> (i32, i32) {
    %c0_i32 = arith.constant 0 : i32
    %c0_i32_0 = arith.constant 0 : i32
    return %arg0, %c0_i32 : i32, i32
  }
}

</mosaic_0001>

<bundles_post_ra>
// kernel: tpu_custom_call.1
= control target key start
LH: loop header
LB: loop body
LE: loop exit
PB: predicated region body
PF: predicated region fallthrough
CT: control target
= control target key end

     0   :  { %8 = vsyncpa [#allocation5], 0  ;;  %s1076_s0 = inlined_call_operand.hbm [shape: f32[16,32], index: 0, kind: input, shape index: {}]   ;;  %s1077_s1 = inlined_call_operand.hbm [shape: f32[32,256], index: 1, kind: input, shape index: {}]   ;;  %s1078_s2 = inlined_call_operand.vmem [shape: f32[1,256], index: 2, kind: input, shape index: {}]   ;;  %s1079_s3 = inlined_call_operand.hbm [shape: f32[16,256], index: 3, kind: output, shape index: {}]  }
   0x1   :  { %9 = vsyncpa [#allocation8], 0 }
   0x2   :  { %11 = vsyncpa [#allocation8 + $0x1], 0 }
   0x3   :  { %12 = vsyncpa [#allocation6], 0  ;;  %s871_s12 = smov 0   ;;  %s873_s13 = smov 0  }
   0x4   :  { %s875_s14 = smov 0   ;;  %s877_s15 = smov 0  }
   0x5   :  { %s879_s16 = smov 0   ;;  %s881_s17 = smov 0  }
   0x6 LB: > { %s535_s18 = sadd.s32 4294967295, %s833_s17   ;;  %p70_p0 = scmp.ne.s32.totalorder %s821_s14, %s817_s13  ;;  %s833_s17 = sphi %s881_s17, %s18_s17   ;;  %s829_s16 = sphi %s879_s16, %s1100_s16   ;;  %s825_s15 = sphi %s877_s15, %s1099_s15   ;;  %s821_s14 = sphi %s875_s14, %s1098_s14   ;;  %s817_s13 = sphi %s873_s13, %s1097_s13   ;;  %s813_s12 = sphi %s871_s12, %s1096_s12  }
   0x7   : > { %p71_p1 = scmp.eq.s32.totalorder %s833_s17, 0  ;;  %p76_p2 = scmp.ne.s32.totalorder %s817_s13, %s813_s12 }
   0x8   : > { %p906_p3 = scmp.eq.s32.totalorder %s535_s18, 0  ;;  %p536_p4 = scmp.ge.s32.totalorder %s833_s17, 1 }
   0x9   : > { %p72_p5 = por %p71_p1, %p70_p0  ;;  %p139_p6 = scmp.lt.s32.totalorder %s833_s17, 3 }
   0xa   : > { %s1085_s19 = scalar_select %p906_p3, 1, 0 }
   0xb   : > { %p914_p7 = por %p906_p3, %p76_p2  ;;  %p918_p8 = pnand %p536_p4, %p139_p6 }
   0xc   : > { %s839_s22 = smov [#allocation4]   ;;  %p601_p11 = scmp.lt.s32.totalorder %s833_s17, 2 }
   0xd   : > { %s1086_s20 = scalar_select %p914_p7, 1, 0 }
   0xe   : > { %s1087_s21 = scalar_select %p918_p8, 1, 0 }
   0xf   : > { %s154_s23 = sshll.u32 %s839_s22, 4  ;;  %p592_p9 = pneg %p918_p8  ;;  %s155_s23 = int_to_ptr.vmem [resolvable:$true] %s154_s23 }
  0x10   : > { %s63_s25 = sadd.s32 1, %s821_s14  ;;  %p932_p12 = pnand %p601_p11, %p72_p5 }
  0x11   : > { %p926_p10 = pnand %p592_p9, %p906_p3  ;;  %s687_s29 = scalar_lea.hbm %s1076_s0, 256 }
  0x12   : > { %s1089_s26 = scalar_select %p932_p12, 1, 0 }
  0x13   : > { %p688_p13 = scmp.ne.s32.totalorder %s1076_s0, %s687_s29  ;;  %p689_p0 = pneg %p926_p10 }
  0x14   : > { %p694_p4 = scmp.lt.u32.totalorder %s687_s29, %s1076_s0 }
  0x15   : > { %p690_p1 = pnand %p689_p0, %p688_p13 }
  0x17   : > { %p691_p2 = pneg %p690_p1 }
  0x19   : > { %p696_p5 = pnand %p694_p4, %p691_p2 }
  0x1b   : > { %699 = shalt.err (!%p696_p5)
}
  0x1c   : > { %s700_s7 = scalar_lea.vmem %s155_s23, 256  ;;  %p708_p7 = scmp.lt.s32.totalorder %s155_s23, %s155_s23 }
  0x1d   : > { %p701_p6 = scmp.ne.s32.totalorder %s155_s23, %s700_s7  ;;  %p709_p3 = scmp.lt.s32.totalorder %s700_s7, %s700_s7 }
  0x1f   : > { %p703_p9 = pnand %p701_p6, %p689_p0  ;;  %p710_p8 = por %p709_p3, %p708_p7 }
  0x21   : > { %p704_p11 = pneg %p703_p9 }
  0x23   : > { %p711_p12 = pnand %p710_p8, %p704_p11 }
  0x25   : > { %714 = shalt.err (!%p711_p12)
}
  0x26   : > { %s840_s8 = smov 128   ;;  %s841_s9 = smov 8  }
  0x27   : > { %595 = dma.hbm_to_vmem [thread:$0]  (!%p926_p10), %s1076_s0, 256, %s155_s23, [#allocation5], %s840_s8, %s840_s8, %s841_s9  }
  0x28   : > { %s27_s12 = sadd.s32 1, %s829_s16  ;;  %s168_s22 = sand.u32 1, %s821_s14  }
  0x29   : > { %p28_p3 = scmp.ge.s32.totalorder %s27_s12, 2  ;;  %s539_s27 = sshll.u32 %s168_s22, 5 }
  0x2a   : > { %s540_s28 = sshll.u32 %s829_s16, 7  ;;  %s172_s23 = scalar_lea.vmem [#allocation7], %s539_s27 }
  0x2b   : > { %s1102_s12 = smov (%p28_p3, %s27_s12), 0  ;;  %s963_s24 = scalar_lea.hbm %s1077_s1, %s540_s28 }
  0x2c   : > { %s60_s4 = ssub.s32 %s829_s16, %s1102_s12  ;;  %s178_s5 = sshll.u32 %s172_s23, 4  ;;  %s967_s5 = int_to_ptr.vmem [resolvable:$true] %s178_s5 }
  0x2d   : > { %p61_p7 = scmp.eq.s32.totalorder %s60_s4, 0  ;;  %s974_s7 = scalar_lea.sflag [#allocation8], %s168_s22 }
  0x2e   : > { %s715_s10 = scalar_lea.hbm %s963_s24, 512  ;;  %p1090_p10 = scmp.ne.s32.totalorder %s1089_s26, 0 }
  0x2f   : > { %s972_s6 = scalar_select %p61_p7, %s821_s14, %s63_s25  }
  0x30   : > { %p716_p8 = scmp.ne.s32.totalorder %s963_s24, %s715_s10  ;;  %p717_p12 = pneg %p1090_p10 }
  0x31   : > { %s720_s27 = scalar_lea.hbm %s1077_s1, 1024  ;;  %p721_p1 = scmp.lt.u32.totalorder %s963_s24, %s1077_s1 }
  0x32   : > { %p718_p13 = pnand %p717_p12, %p716_p8  ;;  %p722_p2 = scmp.lt.u32.totalorder %s720_s27, %s715_s10 }
  0x33   : > { %p724_p5 = scmp.lt.u32.totalorder %s715_s10, %s963_s24 }
  0x34   : > { %p719_p0 = pneg %p718_p13  ;;  %p723_p4 = por %p722_p2, %p721_p1 }
  0x36   : > { %p725_p6 = por %p724_p5, %p723_p4 }
  0x38   : > { %p726_p9 = pnand %p725_p6, %p719_p0 }
  0x3a   : > { %729 = shalt.err (!%p726_p9)
}
  0x3b   : > { %s730_s25 = scalar_lea.vmem %s967_s5, 512  ;;  %s842_s22 = smov [#allocation7]  }
  0x3c   : > { %p731_p11 = scmp.ne.s32.totalorder %s967_s5, %s730_s25  ;;  %s735_s4 = sshll.u32 %s842_s22, 4  ;;  %s736_s4 = int_to_ptr.vmem [resolvable:$false] %s735_s4 }
  0x3d   : > { %s737_s23 = scalar_lea.vmem %s736_s4, 1024  ;;  %p738_p8 = scmp.lt.s32.totalorder %s967_s5, %s736_s4 }
  0x3e   : > { %p733_p3 = pnand %p731_p11, %p717_p12  ;;  %p739_p13 = scmp.lt.s32.totalorder %s737_s23, %s730_s25 }
  0x40   : > { %p734_p7 = pneg %p733_p3  ;;  %p740_p1 = por %p739_p13, %p738_p8 }
  0x42   : > { %p741_p2 = pnand %p740_p1, %p734_p7 }
  0x44   : > { %744 = shalt.err (!%p741_p2)
}
  0x45   : > { %s843_s10 = smov 256   ;;  %p1091_p12 = scmp.ne.s32.totalorder %s1087_s21, 0 }
  0x46   : > { %599 = dma.hbm_to_vmem [thread:$0]  (!%p1090_p10), %s963_s24, 512, %s967_s5, %s974_s7, %s843_s10, %s840_s8, %s841_s9  }
  0x47   : > { %196 = sbr.rel (%p1091_p12) target bundleno = 939 (0x3ab), region = 32  ;;  %p1092_p0 = scmp.ne.s32.totalorder (!%p1091_p12), %s1085_s19, 0 }
  0x4e   : > { %800 = dma.done.wait (%p1092_p0), [#allocation5], 256  }
  0x4f   : > { %802 = vsyncadd (%p1092_p0), [#allocation5], 4294967040  ;;  %s202_s11 = sand.u32 1, %s817_s13   ;;  %p1093_p4 = scmp.ne.s32.totalorder %s1086_s20, 0 }
  0x50   : > { %s543_s28 = sshll.u32 %s202_s11, 5  ;;  %s203_s26 = scalar_lea.sflag [#allocation8], %s202_s11 }
  0x51   : > { %s206_s27 = scalar_lea.vmem [#allocation7], %s543_s28 }
  0x52   : > { %804 = dma.done.wait (%p1093_p4), %s203_s26, 512  }
  0x53   : > { %806 = vsyncadd (%p1093_p4), %s203_s26, 4294966784  ;;  %p228_p10 = scmp.lt.s32.totalorder %s825_s15, 1  ;;  %p544_p5 = scmp.ne.s32.totalorder %s825_s15, 0 }
  0x54   : > { %vm236_vm0 = vcmask (!%p544_p5), 7168   ;;  %v844_v0 = vmov (!%p544_p5), -inf   ;;  %v845_v1 = vmov (!%p544_p5), 0.0  }
  0x55   : > { %s1017_s21 = scalar_select %p228_p10, %s825_s15, 1 }
  0x56   : > { %235 = sbr.rel (%p544_p5) target bundleno = 93 (0x5d), region = 44  ;;  %237 = vst.msk [vmem:[#allocation2] sm:$0xff] (!%p544_p5), %vm236_vm0, %v844_v0  ;;  %238 = vst.msk [vmem:[#allocation2 + $0x8] sm:$0xff] (!%p544_p5), %vm236_vm0, %v844_v0 }
  0x57   : > { %s230_s9 = scalar_lea.vmem %s1078_s2, %s1017_s21  ;;  %239 = vst.msk [vmem:[#allocation3] sm:$0xff] (!%p544_p5), %vm236_vm0, %v845_v1  ;;  %240 = vst.msk [vmem:[#allocation3 + $0x8] sm:$0xff] (!%p544_p5), %vm236_vm0, %v845_v1 }
  0x5d PF: > { %v243_v2 = vld [vmem:[%s206_s27] sm:$0xff]  ;;  %v244_v3 = vld [vmem:[%s206_s27 + $0x8] sm:$0xff]  ;;  %v245_v4 = vld [vmem:[%s206_s27 + $0x10] sm:$0xff]  ;;  %vm254_vm1 = vcmask 261120   ;;  %s548_s20 = sshll.u32 %s825_s15, 7  ;;  %v846_v15 = vmov 0  }
  0x5e   : > { %v574_v5 = vpack.c.bf16 %v244_v3, %v243_v2  ;;  %v246_v6 = vld [vmem:[%s206_s27 + $0x18] sm:$0xff]  ;;  %v241_v7 = vld [vmem:[#allocation4] sm:$0xff]  ;;  %s337_s24 = sshra.s32 %s548_s20, 7  ;;  %672 = vset.pattern.permute.xlu1 %v846_v15  ;;  %673 = vset.pattern.permute.xlu0 %v846_v15  ;;  %vm383_vm2 = vcmask 7168   ;;  %v351_v35 = vld [vmem:[#allocation3] sm:$0xff]  ;;  %p550_p6 = scmp.ne.s32.totalorder %s825_s15, 1 }
  0x5f   : > { %v578_v8 = vpack.c.bf16 %v246_v6, %v245_v4  ;;  %571 = vmatprep.mubr.msk.f32.mxu0 %vm254_vm1, %v241_v7  ;;  %v242_v9 = vld [vmem:[#allocation4 + $0x8] sm:$0xff]  ;;  %s549_s5 = sshll.u32 %s337_s24, 3  ;;  %v545_v10 = vld [vmem:[%s230_s9] ss:$0 sm:$0xff]  ;;  %v352_v39 = vld [vmem:[#allocation3 + $0x8] sm:$0xff]  ;;  %s835_s29 = smov (!%p550_p6), 0  }
  0x60   : > { %575 = vmatprep.subr.bf16.mxu0 %v574_v5  ;;  %s340_s7 = scalar_lea.vmem [#allocation9], %s549_s5  ;;  %v343_v16 = vld [vmem:[#allocation2] sm:$0xff]  ;;  %v344_v19 = vld [vmem:[#allocation2 + $0x8] sm:$0xff] }
  0x61   : > { %577 = vmatpush3.bf16.msra.mxu0 %v574_v5 }
  0x62   : > { %579 = vmatprep.subr.bf16.mxu0 %v578_v8 }
  0x65   : > { %581 = vmatpush3.bf16.msra.mxu0 %v578_v8 }
  0x68   : > { %572 = vmatmul.mubr.msk.f32.vlgmr.msra.gmra.mrb[0].mxu0 %vm254_vm1, %v242_v9 }
 0x13b   : > { %v573_v11 = vpop.f32.mrb[0].mxu0 }
 0x13c   : > { %v333_v12 = vadd.f32 %v573_v11, %v545_v10  ;;  %v327_v13 = vpop.f32.mrb[1].mxu0 }
 0x13d   : > { %v328_v14 = vadd.f32 %v545_v10, %v327_v13 }
 0x13e   : > { %342 = vst [vmem:[%s340_s7 + $0x10] sm:$0xff] %v333_v12 }
 0x13f   : > { %341 = vst [vmem:[%s340_s7] sm:$0xff] %v328_v14  ;;  %345 = vmax.xlane.f32.xlu0 %v328_v14 }
 0x143   : > { %347 = vmax.xlane.f32.xlu0 %v333_v12 }
 0x1cc   : > { %v346_v17 = vpop.xlane.xlu0 %345 }
 0x1cd   : > { %v349_v18 = vmax.f32 %v343_v16, %v346_v17 }
 0x1cf   : > { %v353_v20 = vsub.f32 %v343_v16, %v349_v18  ;;  %386 = vst.msk [vmem:[#allocation2] sm:$0xff] %vm383_vm2, %v349_v18  ;;  %363 = vperm.xlu1 %672, %v349_v18  }
 0x1d0   : > { %v348_v21 = vpop.xlane.xlu0 %347 }
 0x1d1   : > { %v350_v22 = vmax.f32 %v344_v19, %v348_v21  ;;  %v355_v32 = vmul.f32 1.442695, %v353_v20 }
 0x1d3   : > { %v354_v23 = vsub.f32 %v344_v19, %v350_v22  ;;  %387 = vst.msk [vmem:[#allocation2 + $0x8] sm:$0xff] %vm383_vm2, %v350_v22  ;;  %368 = vperm.xlu1 %672, %v350_v22  }
 0x1d5   : > { %v357_v33 = vmul.f32 1.442695, %v354_v23 }
 0x1d6   : > { %v392_v47 = vld [vmem:[#allocation2] sm:$0xff] (!%p550_p6) }
 0x1da   : > { %v393_v49 = vld [vmem:[#allocation2 + $0x8] sm:$0xff] (!%p550_p6) }
 0x24e   : > { %v364_v24 = vpop.permute.xlu1 %363 }
 0x24f   : > { %v371_v25 = vsub.f32 %v328_v14, %v364_v24 }
 0x251   : > { %v373_v26 = vmul.f32 1.442695, %v371_v25 }
 0x252   : > { %v369_v27 = vpop.permute.xlu1 %368 }
 0x253   : > { %674 = vpow2.f32 %v373_v26  ;;  %v372_v28 = vsub.f32 %v333_v12, %v369_v27 }
 0x255   : > { %v375_v29 = vmul.f32 1.442695, %v372_v28 }
 0x257   : > { %676 = vpow2.f32 %v375_v29 }
 0x258   : > { %678 = vpow2.f32 %v355_v32 }
 0x259   : > { %680 = vpow2.f32 %v357_v33 }
 0x25d   : > { %v675_v30 = vpop.eup %674 }
 0x25e   : > { %377 = vadd.xlane.f32.xlu0 %v675_v30 }
 0x261   : > { %v677_v31 = vpop.eup %676 }
 0x262   : > { %379 = vadd.xlane.f32.xlu1 %v677_v31  ;;  %v679_v34 = vpop.eup %678 }
 0x263   : > { %v359_v36 = vmul.f32 %v679_v34, %v351_v35  ;;  %v681_v37 = vpop.eup %680 }
 0x264   : > { %v360_v41 = vmul.f32 %v681_v37, %v352_v39 }
 0x2eb   : > { %v378_v38 = vpop.xlane.xlu0 %377 }
 0x2ec   : > { %v381_v40 = vadd.f32 %v378_v38, %v359_v36  ;;  %391 = sbr.rel (%p550_p6) target bundleno = 913 (0x391), region = 48 }
 0x2ee   : > { %384 = vst.msk [vmem:[#allocation3] sm:$0xff] %vm383_vm2, %v381_v40 }
 0x2ef   : > { %v380_v42 = vpop.xlane.xlu1 %379 }
 0x2f0   : > { %v382_v43 = vadd.f32 %v380_v42, %v360_v41 }
 0x2f2   : > { %385 = vst.msk [vmem:[#allocation3 + $0x8] sm:$0xff] %vm383_vm2, %v382_v43 }
 0x2f5   : > { %v394_v44 = vld [vmem:[#allocation3] sm:$0xff] }
 0x2f6   : > { %682 = vlog2.f32 %v394_v44 }
 0x2f9   : > { %v395_v45 = vld [vmem:[#allocation3 + $0x8] sm:$0xff] }
 0x2fa   : > { %684 = vlog2.f32 %v395_v45 }
 0x300   : > { %v683_v46 = vpop.eup %682 }
 0x301   : > { %v397_v50 = vmul.f32 0.6931472, %v683_v46 }
 0x303   : > { %v400_v52 = vadd.f32 %v397_v50, %v392_v47 }
 0x304   : > { %v685_v48 = vpop.eup %684 }
 0x305   : > { %v399_v51 = vmul.f32 0.6931472, %v685_v48 }
 0x307   : > { %v401_v53 = vadd.f32 %v399_v51, %v393_v49 }
 0x308 LB: >> { %v847_v54 = vmov 0   ;;  %s551_s15 = sshll.u32 %s837_s29, 7  ;;  %s407_s29 = sadd.s32 1, %s837_s29   ;;  %s837_s29 = sphi %s835_s29, %s407_s29  }
 0x309   : >> { %686 = vset.pattern.permute.xlu0 %v847_v54  ;;  %s409_s30 = sshra.s32 %s551_s15, 7  ;;  %p404_p9 = scmp.ge.s32.totalorder %s407_s29, 2  }
 0x30a   : >> { %417 = vperm.xlu0 %686, %v400_v52   ;;  %s552_s25 = sshll.u32 %s409_s30, 3 }
 0x30b   : >> { %s412_s22 = scalar_lea.vmem [#allocation9], %s552_s25 }
 0x30c   : >> { %v413_v55 = vld [vmem:[%s412_s22] sm:$0xff]  ;;  %v414_v58 = vld [vmem:[%s412_s22 + $0x10] sm:$0xff] }
 0x30e   : >> { %422 = vperm.xlu0 %686, %v401_v53  }
 0x389   : >> { %v418_v56 = vpop.permute.xlu0 %417 }
 0x38a   : >> { %v425_v57 = vsub.f32 %v413_v55, %v418_v56  ;;  %406 = sbr.rel (!%p404_p9) target bundleno = 776 (0x308), region = 96 }
 0x38c   : >> { %427 = vst [vmem:[%s412_s22] sm:$0xff] %v425_v57 }
 0x38d   : >> { %v423_v59 = vpop.permute.xlu0 %422 }
 0x38e   : >> { %v426_v60 = vsub.f32 %v414_v58, %v423_v59 }
 0x390   : >> { %428 = vst [vmem:[%s412_s22 + $0x10] sm:$0xff] %v426_v60 }
 0x391 PF: > { %p1032_p11 = scmp.eq.s32.totalorder %s535_s18, 1  ;;  %s848_s23 = smov [#allocation9]  }
 0x392   : > { %s439_s10 = sshll.u32 %s848_s23, 4  ;;  %s440_s10 = int_to_ptr.vmem [resolvable:$true] %s439_s10 }
 0x393   : > { %s745_s11 = scalar_lea.vmem %s440_s10, 512  ;;  %p752_p13 = scmp.lt.s32.totalorder %s440_s10, %s440_s10 }
 0x394   : > { %p746_p3 = scmp.ne.s32.totalorder %s440_s10, %s745_s11  ;;  %p753_p1 = scmp.lt.s32.totalorder %s745_s11, %s745_s11 }
 0x396   : > { %p747_p7 = pnand %p746_p3, %p1032_p11  ;;  %p754_p2 = por %p753_p1, %p752_p13 }
 0x398   : > { %p748_p8 = pneg %p747_p7 }
 0x39a   : > { %p755_p12 = pnand %p754_p2, %p748_p8 }
 0x39c   : > { %758 = shalt.err (!%p755_p12)
}
 0x39d   : > { %s759_s18 = scalar_lea.hbm %s1079_s3, 512 }
 0x39e   : > { %p760_p0 = scmp.ne.s32.totalorder %s1079_s3, %s759_s18  ;;  %p765_p5 = scmp.lt.u32.totalorder %s759_s18, %s1079_s3 }
 0x3a0   : > { %p761_p4 = pnand %p760_p0, %p1032_p11 }
 0x3a2   : > { %p762_p10 = pneg %p761_p4 }
 0x3a4   : > { %p767_p6 = pnand %p765_p5, %p762_p10 }
 0x3a6   : > { %770 = shalt.err (!%p767_p6)
}
 0x3a7   : > { %s849_s9 = smov 256   ;;  %s850_s20 = smov 16  }
 0x3a8   : > { %589 = dma.vmem_to_hbm [thread:$0]  (%p1032_p11), %s440_s10, 512, %s1079_s3, [#allocation6], %s849_s9, %s849_s9, %s850_s20  }
 0x3a9   : > { %808 = dma.done.wait (%p1032_p11), [#allocation6], 512  }
 0x3aa   : > { %810 = vsyncadd (%p1032_p11), [#allocation6], 4294966784 }
 0x3ab PF: > { %s18_s17 = sadd.s32 1, %s833_s17   ;;  %s1095_s7 = smov %s1102_s12 }
 0x3ac   : > { %p15_p9 = scmp.ge.s32.totalorder %s18_s17, 4   ;;  %s1096_s12 = smov %s817_s13 }
 0x3ad   : > { %s1097_s13 = smov %s821_s14  ;;  %s1098_s14 = smov %s972_s6 }
 0x3ae   : > { %s1099_s15 = smov %s829_s16  ;;  %s1100_s16 = smov %s1095_s7 }
 0x3af   :  { %17 = sbr.rel (!%p15_p9) target bundleno = 6 (0x6), region = 107 }
 0x3b6   :  { %455 = vsyncpa [#allocation5], 1 }
 0x3b7   :  { %457 = vsyncpa [#allocation5 + $0x1], 1 }
 0x3b8   :  { %458 = vsyncpa [#allocation8], 1 }
 0x3b9   :  { %460 = vsyncpa [#allocation8 + $0x1], 1 }
 0x3ba   :  { %461 = vsyncpa [#allocation6], 1 }
 0x3bb   :  { %463 = vsyncpa [#allocation6 + $0x1], 1 }

</bundles_post_ra>
